<compile_context>
chip_gen: v5e
topology: v5e:2x2
jax: 0.10.0
libtpu: 0.0.40
codegen_flags: <defaults>
</compile_context>

<pallas_src>
import functools

import jax
import jax.numpy as jnp
from jax.experimental import pallas as pl
from jax.experimental.pallas import tpu as pltpu


def _round_up(x, m):
    return (x + m - 1) // m * m


def _resident_spec(block_shape, index_map):
    """BlockSpec for a block whose index_map is constant (resident in VMEM).

    Requests single-buffering (pure VMEM saving) when the installed Pallas
    exposes pipeline_mode; falls back to a plain BlockSpec otherwise.
    """
    try:
        return pl.BlockSpec(block_shape, index_map, pipeline_mode=pl.Buffered(1))
    except Exception:  # pipeline_mode / Buffered not available in this version
        return pl.BlockSpec(block_shape, index_map)


# ---------------------------------------------------------------------------
# Pallas kernel: one fused matmul + bias   out = patches @ W_fold + b_fold
# ---------------------------------------------------------------------------
def _semg2vec_kernel(p_ref, w_ref, b_ref, out_ref):
    # p_ref   : (1, TP, K1) bf16   flattened-patch tile (one batch element)
    # w_ref   : (K1, F2)    bf16   folded (embed @ hidden) weight, resident
    # b_ref   : (1,  F2)    f32    folded bias, resident
    # out_ref : (1, TP, F2) out_dtype
    acc = jnp.dot(p_ref[0], w_ref[...], preferred_element_type=jnp.float32)
    out_ref[0] = (acc + b_ref[...]).astype(out_ref.dtype)


def _fused_projection(patches, w_fold, b_fold, *, tp, out_dtype):
    """patches: (B, P_pad, K1) bf16 -> (B, P_pad, F2) out_dtype."""
    B, P_pad, K1 = patches.shape
    F2 = w_fold.shape[1]
    n_pt = P_pad // tp
    grid = (B, n_pt)
    out_bytes = jnp.dtype(out_dtype).itemsize

    flops = 2 * B * P_pad * K1 * F2
    bytes_accessed = (
        B * P_pad * K1 * 2        # patches (bf16)
        + K1 * F2 * 2             # folded weight (bf16)
        + F2 * 4                  # folded bias (f32)
        + B * P_pad * F2 * out_bytes
    )

    # Explicit scoped-VMEM limit (v7x has 64 MiB physical / 32 MiB default).
    vmem_need = (
        2 * tp * K1 * 2           # double-buffered patch tile
        + 2 * tp * F2 * out_bytes # double-buffered output tile
        + 2 * K1 * F2 * 2         # weight (worst case double-buffered)
        + 2 * F2 * 4              # bias
    )
    vmem_limit = int(min(max(4 * vmem_need, 16 * 1024 * 1024), 32 * 1024 * 1024))

    return pl.pallas_call(
        _semg2vec_kernel,
        out_shape=jax.ShapeDtypeStruct((B, P_pad, F2), out_dtype),
        grid_spec=pltpu.PrefetchScalarGridSpec(
            num_scalar_prefetch=0,
            grid=grid,
            in_specs=[
                pl.BlockSpec((1, tp, K1), lambda b, j: (b, j, 0)),   # streamed rows
                _resident_spec((K1, F2), lambda b, j: (0, 0)),       # resident weight
                _resident_spec((1, F2), lambda b, j: (0, 0)),        # resident bias
            ],
            out_specs=pl.BlockSpec((1, tp, F2), lambda b, j: (b, j, 0)),
        ),
        compiler_params=pltpu.CompilerParams(
            dimension_semantics=("parallel", "parallel"),
            vmem_limit_bytes=vmem_limit,
        ),
        cost_estimate=pl.CostEstimate(
            flops=flops, transcendentals=0, bytes_accessed=bytes_accessed
        ),
    )(patches, w_fold, b_fold)


# ---------------------------------------------------------------------------
# Semg2vec forward (glue + kernel call). Returns two slabs:
#   x_pre  : (B, num_patches-2, flat_patch)
#   x_post : (B, num_patches-2, flat_patch)
# ---------------------------------------------------------------------------
def semg2vec_forward(x, params, img_size, patch_size, in_chans, embed_dim,
                     out_dtype=jnp.bfloat16):
    """x: (B, C, H, W) float32, NCHW (same convention as the PyTorch module)."""
    B, C, H, W = x.shape
    assert H == img_size[0] and W == img_size[1], "input size mismatch"
    ph, pw = patch_size
    gh, gw = H // ph, W // pw
    num_patches = gh * gw
    flat_patch = ph * pw * in_chans
    K1 = C * ph * pw
    F2 = 2 * flat_patch

    if num_patches < 3:
        raise ValueError("Semg2vec needs num_patches >= 3 (interior patches).")

    # --- fold the two linear layers (no nonlinearity between them):
    #     out = (p @ W1 + b1) @ W2 + b2 = p @ (W1 @ W2) + (b1 @ W2 + b2)
    w1 = params["proj_w"].reshape(embed_dim, K1).T            # (K1, E) f32
    b1 = params["proj_b"]                                     # (E,)
    w2 = params["hidden_w"].T                                 # (E, F2)
    b2 = params["hidden_b"]                                   # (F2,)
    w_fold = (w1 @ w2).astype(jnp.bfloat16)                   # (K1, F2) bf16
    b_fold = (b1 @ w2 + b2).reshape(1, F2).astype(jnp.float32)

    # --- extract non-overlapping patches; cast to bf16 BEFORE the layout
    #     change so the materialized patch slab is half-width.  Flatten in
    #     (C, ph, pw) order so the matmul reproduces Conv2d exactly.
    xb = x.astype(jnp.bfloat16)
    patches = xb.reshape(B, C, gh, ph, gw, pw)
    patches = jnp.transpose(patches, (0, 2, 4, 1, 3, 5))       # (B, gh, gw, C, ph, pw)
    patches = patches.reshape(B, num_patches, K1)              # (B, P, K1)

    # --- patch-axis tiling (rows per grid step).
    TP_MAX = 512
    if num_patches > TP_MAX:
        tp = TP_MAX
    else:
        tp = num_patches
        if B == 1 and num_patches >= 16:
            # split the patch axis so the grid has >= 2 steps (v7x megacore).
            tp = _round_up(-(-num_patches // 2), 8)
    p_pad = _round_up(num_patches, tp)
    if p_pad != num_patches:
        patches = jnp.pad(patches, ((0, 0), (0, p_pad - num_patches), (0, 0)))

    out = _fused_projection(patches, w_fold, b_fold, tp=tp, out_dtype=out_dtype)
    # out: (B, p_pad, F2) -- written directly by the kernel, no unpad/reshape.

    # --- interior patches only (matches the PyTorch range(1, P-1) loop),
    #     then the single lane-dense slab is split into pre / post halves.
    interior = out[:, 1:num_patches - 1, :]                    # (B, P-2, F2)
    x_pre = interior[..., :flat_patch]
    x_post = interior[..., flat_patch:]
    return x_pre, x_post


def preds_as_list(x_pre, x_post):
    """Original PyTorch interface: [pre_1, post_1, pre_2, post_2, ...].

    Single stack/transpose/reshape (no per-patch slice loop); keep out of
    hot paths.
    """
    B, pm2, f = x_pre.shape
    stacked = jnp.stack([x_pre, x_post], axis=2)        # (B, P-2, 2, F)
    stacked = jnp.transpose(stacked, (1, 2, 0, 3))      # (P-2, 2, B, F)
    stacked = stacked.reshape(2 * pm2, B, f)
    return list(stacked)


# ---------------------------------------------------------------------------
# Deterministic parameter init (synthetic; shapes match the nn.Module)
# ---------------------------------------------------------------------------
def init_params(key, patch_size, in_chans, embed_dim):
    ph, pw = patch_size
    flat_patch = ph * pw * in_chans
    k1, k2, k3, k4 = jax.random.split(key, 4)
    return {
        "proj_w": jax.random.normal(k1, (embed_dim, in_chans, ph, pw), jnp.float32) * 0.02,
        "proj_b": jax.random.normal(k2, (embed_dim,), jnp.float32) * 0.02,
        "hidden_w": jax.random.normal(k3, (2 * flat_patch, embed_dim), jnp.float32) * 0.02,
        "hidden_b": jax.random.normal(k4, (2 * flat_patch,), jnp.float32) * 0.02,
    }


# ---------------------------------------------------------------------------
# Pure-JAX f32 reference (two un-fused matmuls) for a sanity check
# ---------------------------------------------------------------------------
def reference_forward(x, params, img_size, patch_size, in_chans, embed_dim):
    B, C, H, W = x.shape
    ph, pw = patch_size
    gh, gw = H // ph, W // pw
    num_patches = gh * gw
    flat_patch = ph * pw * in_chans
    patches = x.reshape(B, C, gh, ph, gw, pw)
    patches = jnp.transpose(patches, (0, 2, 4, 1, 3, 5)).reshape(B * num_patches, -1)
    w1 = params["proj_w"].reshape(embed_dim, -1).T
    emb = patches @ w1 + params["proj_b"]
    out = emb @ params["hidden_w"].T + params["hidden_b"]
    out = out.reshape(B, num_patches, 2 * flat_patch)
    pre_post = out[:, 1:-1, :]
    return pre_post[..., :flat_patch], pre_post[..., flat_patch:]


if __name__ == "__main__":
    # Small config consistent with the module's forward
    img_size = (16, 16)
    patch_size = (4, 4)
    in_chans = 4
    embed_dim = 32
    B = 2

    key = jax.random.PRNGKey(0)
    kx, kp = jax.random.split(key)
    x = jax.random.normal(kx, (B, in_chans, img_size[0], img_size[1]), jnp.float32)
    params = init_params(kp, patch_size, in_chans, embed_dim)

    fwd = jax.jit(
        functools.partial(
            semg2vec_forward,
            img_size=img_size,
            patch_size=patch_size,
            in_chans=in_chans,
            embed_dim=embed_dim,
        )
    )
    x_pre, x_post = fwd(x, params)
    x_pre = jax.block_until_ready(x_pre)
    x_post = jax.block_until_ready(x_post)

    # sanity check against the pure-JAX f32 reference.
    # (bf16 patches / folded weight / bf16 output storage reorder f32 rounding,
    #  so the match is at bf16-level precision rather than bit-exact.)
    ref_pre, ref_post = reference_forward(x, params, img_size, patch_size, in_chans, embed_dim)
    num_patches = (img_size[0] // patch_size[0]) * (img_size[1] // patch_size[1])
    flat_patch = patch_size[0] * patch_size[1] * in_chans

    assert x_pre.shape == (B, num_patches - 2, flat_patch)
    assert x_post.shape == (B, num_patches - 2, flat_patch)
    assert jnp.allclose(x_pre.astype(jnp.float32), ref_pre, atol=5e-3, rtol=1e-2)
    assert jnp.allclose(x_post.astype(jnp.float32), ref_post, atol=5e-3, rtol=1e-2)

    # original list-of-tensors interface still available on request
    preds = preds_as_list(x_pre, x_post)
    assert len(preds) == 2 * (num_patches - 2)
    assert all(p.shape == (B, flat_patch) for p in preds)

    print("KERNEL_OK")
</pallas_src>

<mosaic_0001>
module attributes {stable_mosaic.version = 11 : i64} {
  func.func @_semg2vec_kernel(%arg0: i32, %arg1: i32, %arg2: memref<1x16x64xbf16, #tpu.memory_space<vmem>>, %arg3: memref<64x128xbf16, #tpu.memory_space<vmem>>, %arg4: memref<1x128xf32, #tpu.memory_space<vmem>>, %arg5: memref<1x16x128xbf16, #tpu.memory_space<vmem>>) attributes {dimension_semantics = [#tpu.dimension_semantics<parallel>, #tpu.dimension_semantics<parallel>], iteration_bounds = array<i64: 2, 1>, scalar_prefetch = 0 : i64, scratch_operands = 0 : i64, tpu.core_type = #tpu.core_type<tc>, window_params = [{transform_indices = @transform_0, window_bounds = array<i64: 1, 16, 64>}, {pipeline_mode = #tpu.pipeline_mode<synchronous>, transform_indices = @transform_1, window_bounds = array<i64: 64, 128>}, {pipeline_mode = #tpu.pipeline_mode<synchronous>, transform_indices = @transform_2, window_bounds = array<i64: 1, 128>}, {transform_indices = @transform_3, window_bounds = array<i64: 1, 16, 128>}]} {
    %c0 = arith.constant 0 : index
    %c0_0 = arith.constant 0 : index
    %c0_1 = arith.constant 0 : index
    %0 = vector.load %arg2[%c0, %c0_0, %c0_1] : memref<1x16x64xbf16, #tpu.memory_space<vmem>>, vector<1x16x64xbf16>
    %1 = vector.shape_cast %0 : vector<1x16x64xbf16> to vector<16x64xbf16>
    %c0_2 = arith.constant 0 : index
    %c0_3 = arith.constant 0 : index
    %2 = vector.load %arg3[%c0_2, %c0_3] : memref<64x128xbf16, #tpu.memory_space<vmem>>, vector<64x128xbf16>
    %cst = arith.constant dense<0.000000e+00> : vector<16x128xf32>
    %3 = tpu.matmul %1, %2, %cst {dimension_numbers = #tpu.dot_dimension_numbers<[1], [0], [0], [1], [0, 0, 1, 1], [], []>} : vector<16x64xbf16>, vector<64x128xbf16>, vector<16x128xf32> -> vector<16x128xf32>
    %c0_4 = arith.constant 0 : index
    %c0_5 = arith.constant 0 : index
    %4 = vector.load %arg4[%c0_4, %c0_5] : memref<1x128xf32, #tpu.memory_space<vmem>>, vector<1x128xf32>
    %5 = vector.broadcast %4 : vector<1x128xf32> to vector<16x128xf32>
    %6 = arith.addf %3, %5 : vector<16x128xf32>
    %7 = arith.truncf %6 : vector<16x128xf32> to vector<16x128xbf16>
    %c0_6 = arith.constant 0 : index
    %c0_7 = arith.constant 0 : index
    %c0_8 = arith.constant 0 : index
    %8 = vector.load %arg5[%c0_6, %c0_7, %c0_8] : memref<1x16x128xbf16, #tpu.memory_space<vmem>>, vector<1x16x128xbf16>
    %9 = vector.shape_cast %8 : vector<1x16x128xbf16> to vector<16x128xbf16>
    %10 = vector.shape_cast %7 : vector<16x128xbf16> to vector<1x16x128xbf16>
    tpu.vector_store %arg5[%c0_6, %c0_7, %c0_8], %10 {strides = array<i32>} : memref<1x16x128xbf16, #tpu.memory_space<vmem>>, vector<1x16x128xbf16>,
    return
  }
  func.func @transform_0(%arg0: i32, %arg1: i32) -> (i32, i32, i32) {
    %c0_i32 = arith.constant 0 : i32
    %c0_i32_0 = arith.constant 0 : i32
    return %arg0, %arg1, %c0_i32 : i32, i32, i32
  }
  func.func @transform_1(%arg0: i32, %arg1: i32) -> (i32, i32) {
    %c0_i32 = arith.constant 0 : i32
    %c0_i32_0 = arith.constant 0 : i32
    %c0_i32_1 = arith.constant 0 : i32
    return %c0_i32, %c0_i32_0 : i32, i32
  }
  func.func @transform_2(%arg0: i32, %arg1: i32) -> (i32, i32) {
    %c0_i32 = arith.constant 0 : i32
    %c0_i32_0 = arith.constant 0 : i32
    %c0_i32_1 = arith.constant 0 : i32
    return %c0_i32, %c0_i32_0 : i32, i32
  }
  func.func @transform_3(%arg0: i32, %arg1: i32) -> (i32, i32, i32) {
    %c0_i32 = arith.constant 0 : i32
    %c0_i32_0 = arith.constant 0 : i32
    return %arg0, %arg1, %c0_i32 : i32, i32, i32
  }
}

</mosaic_0001>

<bundles_post_ra>
// kernel: semg2vec_forward.1
= control target key start
LH: loop header
LB: loop body
LE: loop exit
PB: predicated region body
PF: predicated region fallthrough
CT: control target
= control target key end

     0   :  { %s476_s12 = smov 0   ;;  %s478_s13 = smov 0   ;;  %s524_s0 = inlined_call_operand.vmem [shape: bf16[2,16,64], index: 0, kind: input, shape index: {}]   ;;  %s525_s1 = inlined_call_operand.vmem [shape: bf16[64,128], index: 1, kind: input, shape index: {}]   ;;  %s526_s2 = inlined_call_operand.vmem [shape: f32[1,128], index: 2, kind: input, shape index: {}]   ;;  %s527_s3 = inlined_call_operand.vmem [shape: bf16[2,16,128], index: 3, kind: output, shape index: {}]  }
   0x1   :  { %s480_s14 = smov 0  }
   0x2 LB: > { %s25_s15 = sadd.s32 1, %s450_s13  ;;  %p367_p0 = scmp.ge.s32.totalorder %s454_s14, 1  ;;  %s454_s14 = sphi %s480_s14, %s13_s14   ;;  %s450_s13 = sphi %s478_s13, %s529_s13   ;;  %s446_s12 = sphi %s476_s12, %s528_s12  }
   0x3   : > { %p27_p1 = scmp.ge.s32.totalorder %s25_s15, 2  ;;  %p158_p2 = scmp.lt.s32.totalorder %s454_s14, 3 }
   0x5   : > { %s531_s15 = smov (%p27_p1, %s25_s15), 0  ;;  %p159_p3 = pnand %p367_p0, %p158_p2 }
   0x6   : > { %p191_p4 = scmp.lt.s32.totalorder (!%p159_p3), %s446_s12, 1 }
   0x7   : > { %162 = sbr.rel (%p159_p3) target bundleno = 167 (0xa7), region = 32 }
   0xc   : > { %v401_v0 = vld [vmem:[%s525_s1 + $0x18] sm:$0xff]  ;;  %v400_v1 = vld [vmem:[%s525_s1 + $0x10] sm:$0xff]  ;;  %s533_s12 = smov (!%p191_p4, %s446_s12), 1  ;;  %v399_v2 = vld [vmem:[%s525_s1 + $0x8] sm:$0xff]  ;;  %vm254_vm0 = vcmask 523264  }
   0xd   : > { %262 = vmatpush.bf16.msra.mxu0 %v401_v0  ;;  %s395_s22 = sshll.u32 %s533_s12, 3  ;;  %v398_v3 = vld [vmem:[%s525_s1] sm:$0xff] }
   0xe   : > { %s198_s27 = scalar_lea.vmem %s524_s0, %s395_s22  ;;  %v431_v6 = vld [vmem:[%s526_s2] ss:$0 sm:$0xff]  ;;  %s208_s5 = scalar_lea.vmem %s527_s3, %s395_s22 }
   0xf   : > { %v397_v4 = vld [vmem:[%s198_s27] sm:$0xff] }
  0x11   : > { %263 = vmatpush.bf16.msra.mxu0 %v400_v1 }
  0x15   : > { %264 = vmatpush.bf16.msra.mxu0 %v399_v2 }
  0x19   : > { %265 = vmatpush.bf16.msra.mxu0 %v398_v3 }
  0x1c   : > { %392 = vmatmul.msk.bf16.vlgmr.msra.gmra.mxu0 %vm254_vm0, %v397_v4 }
  0x99   : > { %v267_v5 = vpop.f32.mrf.mxu0 }
  0x9a   : > { %v268_v8 = vadd.f32 %v431_v6, %v267_v5 }
  0xa1   : > { %v269_v7 = vpop.f32.mrf.mxu0 }
  0xa2   : > { %v270_v9 = vadd.f32 %v431_v6, %v269_v7 }
  0xa4   : > { %v405_v10 = vpack.c.bf16 %v270_v9, %v268_v8 }
  0xa6   : > { %406 = vst [vmem:[%s208_s5] sm:$0xff] %v405_v10  }
  0xa7 PF: > { %s13_s14 = sadd.s32 1, %s454_s14   ;;  %s528_s12 = smov %s450_s13 }
  0xa8   : > { %p10_p5 = scmp.ge.s32.totalorder %s13_s14, 4   ;;  %s529_s13 = smov %s531_s15 }
  0xaa   :  { %12 = sbr.rel (!%p10_p5) target bundleno = 2 (0x2), region = 62 }

</bundles_post_ra>
